<compile_context>
chip_gen: v7x
topology: tpu7x:2x2x1
jax: 0.10.0
libtpu: 0.0.40
codegen_flags: <defaults>
</compile_context>

<pallas_src>
import numpy as np
import jax
import jax.numpy as jnp
from jax.experimental import pallas as pl
from jax.experimental.pallas import tpu as pltpu

_ACT = {
    "ReLU": lambda x: jnp.maximum(x, 0.0),
    "SeLU": jax.nn.selu,
    "Sigmoid": jax.nn.sigmoid,
    "Tanh": jnp.tanh,
}


# ---------------------------------------------------------------------------
# Parameter layout helpers (mirror mlp.split_sizes / mlp.forward views)
# ---------------------------------------------------------------------------
def _normalize_widths(layerwidths):
    return [layerwidths] if isinstance(layerwidths, int) else list(layerwidths)


def _split_sizes(input_dim, layerwidths):
    sizes = [input_dim * layerwidths[0], layerwidths[0]]
    for i in range(1, len(layerwidths)):
        sizes += [layerwidths[i - 1] * layerwidths[i], layerwidths[i]]
    sizes += [layerwidths[-1], 1]
    return sizes


def pack_params(theta, input_dim, layerwidths):
    """One-time packing of flat (E, param_count) theta into per-layer arrays.

    Equivalent to torch.split(split_sizes, dim=1) + the .view()s in
    mlp.forward.  Do this ONCE per parameter update, not per forward call.

    Returns [W0, b0, W1, b1, ..., wf, bf] with shapes:
      Wi : (E, L_out_i, L_in_i)   (natural PyTorch row-major layout)
      bi : (E, 1, L_out_i)
      wf : (E, 1, L_last)
      bf : (E, 1)
    """
    layerwidths = _normalize_widths(layerwidths)
    E = theta.shape[0]
    sizes = _split_sizes(input_dim, layerwidths)
    assert theta.shape[1] == int(np.sum(sizes)), (
        f"param_count mismatch: theta has {theta.shape[1]}, "
        f"layout expects {int(np.sum(sizes))}")
    offs = np.concatenate([[0], np.cumsum(sizes)])
    pieces = [theta[:, offs[i]:offs[i + 1]] for i in range(len(sizes))]
    in_feats = [input_dim] + layerwidths

    packed = []
    for i, w in enumerate(layerwidths):
        packed.append(pieces[2 * i].reshape(E, w, in_feats[i]))   # (E, L_out, L_in)
        packed.append(pieces[2 * i + 1].reshape(E, 1, w))         # (E, 1, L_out)
    packed.append(pieces[-2].reshape(E, 1, layerwidths[-1]))      # (E, 1, L_last)
    packed.append(pieces[-1].reshape(E, 1))                       # (E, 1)
    return packed


# ---------------------------------------------------------------------------
# Kernel
# ---------------------------------------------------------------------------
def _make_kernel(nblayers, activation, size_ensemble):
    act = _ACT[activation]

    def kernel(x_ref, *refs):
        out_ref = refs[-1]
        p = refs[:-1]

        x = x_ref[...]                                   # (TB, D), already f32
        tb, d = x.shape
        # Broadcast once so every layer is a single E-batched matmul.
        h = jnp.broadcast_to(x, (size_ensemble, tb, d))  # (E, TB, D)

        for i in range(nblayers):
            w = p[2 * i][...]                            # (E, L_out, L_in)
            b = p[2 * i + 1][...]                        # (E, 1, L_out)
            # sum_k h[e,b,k] * W[e,h,k]  ==  h @ W.T  per member
            h = act(jnp.einsum("ebk,ehk->ebh", h, w,
                               preferred_element_type=jnp.float32) + b)

        wf = p[-2][...]                                  # (E, 1, L_last)
        bf = p[-1][...]                                  # (E, 1)
        # Final layer has a single output unit: VPU multiply + lane reduce
        # instead of an N=1 MXU matmul.
        out = jnp.sum(h * wf, axis=-1) + bf              # (E, TB), lane-dense
        out_ref[...] = out.astype(out_ref.dtype)

    return kernel


# ---------------------------------------------------------------------------
# Wrapper
# ---------------------------------------------------------------------------
def ensemble_forward(X, packed, input_dim, layerwidths, activation="ReLU",
                     aggregate=False, block_batch=None):
    """Pallas equivalent of Ensemble.forward.

    X:      (batch, input_dim) float32
    packed: output of pack_params(theta, input_dim, layerwidths)
    returns (size_ensemble, batch, 1)  (or (1, batch, 1) if aggregate=True)
    """
    layerwidths = _normalize_widths(layerwidths)
    nbl = len(layerwidths)
    E = packed[0].shape[0]
    B, D = X.shape
    assert D == input_dim

    # Batch tiling: single step for small B; tile (multiple of 128 lanes on the
    # output slab) for large B so per-block VMEM stays small (v7x: 64 MiB).
    if block_batch is None:
        block_batch = B if B <= 1024 else 1024
    tb = min(block_batch, B)
    nb = pl.cdiv(B, tb)

    X = X.astype(jnp.float32)

    in_specs = [pl.BlockSpec((tb, input_dim), lambda b: (b, 0))]
    for arr in packed:
        # Whole array resident in VMEM; same block every step -> DMA'd once.
        in_specs.append(
            pl.BlockSpec(arr.shape, lambda b, _nd=arr.ndim: (0,) * _nd))
    out_spec = pl.BlockSpec((E, tb), lambda b: (0, b))

    y = pl.pallas_call(
        _make_kernel(nbl, activation, E),
        out_shape=jax.ShapeDtypeStruct((E, B), jnp.float32),
        grid=(nb,),
        in_specs=in_specs,
        out_specs=out_spec,
        compiler_params=pltpu.CompilerParams(
            dimension_semantics=("parallel",)),   # batch blocks independent
    )(X, *packed)

    y = y[:, :, None]                    # (E, B, 1) to match the module
    if aggregate:                        # Ensemble.aggregate path
        y = y.mean(axis=0, keepdims=True)
    return y
    # TODO(synk): preprocess/postprocess hooks of Ensemble are identity here.


# ---------------------------------------------------------------------------
# Init + numpy reference (for verification)
# ---------------------------------------------------------------------------
def init_ensemble_params(key, size_ensemble, input_dim, layerwidths):
    """Re-implementation of Ensemble.init_parameters (pytorch_init=True):
    per-layer uniform(-k, k) with k = sqrt(1/fan_in), concatenated flat."""
    layerwidths = _normalize_widths(layerwidths)
    in_feats = [input_dim] + layerwidths
    counts = [(input_dim + 1) * layerwidths[0]]
    for i in range(1, len(layerwidths)):
        counts += [layerwidths[i - 1] * layerwidths[i] + layerwidths[i]]
    counts += [layerwidths[-1] + 1]
    segs = []
    for n, fan_in in zip(counts, in_feats):
        key, sub = jax.random.split(key)
        k = float(np.sqrt(1.0 / fan_in))
        segs.append(jax.random.uniform(sub, (size_ensemble, n),
                                       minval=-k, maxval=k, dtype=jnp.float32))
    return jnp.concatenate(segs, axis=1)


def _selu_np(x):
    alpha = 1.6732632423543772848170429916717
    scale = 1.0507009873554804934193349852946
    return scale * np.where(x > 0, x, alpha * (np.exp(x) - 1.0))


def _reference_forward(X, theta, input_dim, layerwidths, activation="ReLU"):
    """Pure-numpy reference mirroring mlp.forward."""
    layerwidths = _normalize_widths(layerwidths)
    act = {"ReLU": lambda x: np.maximum(x, 0.0),
           "Tanh": np.tanh,
           "Sigmoid": lambda x: 1.0 / (1.0 + np.exp(-x)),
           "SeLU": _selu_np}[activation]
    X = np.asarray(X, np.float32)
    theta = np.asarray(theta, np.float32)
    E, B = theta.shape[0], X.shape[0]
    sizes = _split_sizes(input_dim, layerwidths)
    offs = np.concatenate([[0], np.cumsum(sizes)])
    pieces = [theta[:, offs[i]:offs[i + 1]] for i in range(len(sizes))]
    in_feats = [input_dim] + layerwidths
    out = np.zeros((E, B, 1), np.float32)
    for e in range(E):
        h = X
        for i in range(len(layerwidths)):
            W = pieces[2 * i][e].reshape(layerwidths[i], in_feats[i])
            b = pieces[2 * i + 1][e].reshape(1, layerwidths[i])
            h = act(h @ W.T + b)
        wf = pieces[-2][e].reshape(layerwidths[-1], 1)
        bf = pieces[-1][e].reshape(1, 1)
        out[e] = h @ wf + bf
    return out


if __name__ == "__main__":
    # Small shapes consistent with Ensemble.forward: X is (batch, input_dim).
    size_ensemble = 5
    input_dim = 4
    batch = 8
    layerwidths = [32, 16]

    key = jax.random.PRNGKey(0)
    kx, kp = jax.random.split(key)
    X = jax.random.normal(kx, (batch, input_dim), dtype=jnp.float32)
    theta = init_ensemble_params(kp, size_ensemble, input_dim, layerwidths)

    # Pack once, outside the per-call path (review item: no per-call
    # split/reshape traffic).
    packed = pack_params(theta, input_dim, layerwidths)

    for activation in ("ReLU", "Tanh", "SeLU"):
        y = ensemble_forward(X, packed, input_dim, layerwidths, activation)
        y = jax.block_until_ready(y)
        assert y.shape == (size_ensemble, batch, 1)
        y_ref = _reference_forward(X, theta, input_dim, layerwidths, activation)
        np.testing.assert_allclose(np.asarray(y), y_ref, rtol=1e-5, atol=1e-5)

    print("KERNEL_OK")
</pallas_src>

<mosaic_0001>
module attributes {stable_mosaic.version = 11 : i64} {
  func.func @kernel(%arg0: i32, %arg1: memref<8x4xf32, #tpu.memory_space<vmem>>, %arg2: memref<5x32x4xf32, #tpu.memory_space<vmem>>, %arg3: memref<5x1x32xf32, #tpu.memory_space<vmem>>, %arg4: memref<5x16x32xf32, #tpu.memory_space<vmem>>, %arg5: memref<5x1x16xf32, #tpu.memory_space<vmem>>, %arg6: memref<5x1x16xf32, #tpu.memory_space<vmem>>, %arg7: memref<5x1xf32, #tpu.memory_space<vmem>>, %arg8: memref<5x8xf32, #tpu.memory_space<vmem>>) attributes {dimension_semantics = [#tpu.dimension_semantics<parallel>], iteration_bounds = array<i64: 1>, scalar_prefetch = 0 : i64, scratch_operands = 0 : i64, tpu.core_type = #tpu.core_type<tc>, window_params = [{transform_indices = @transform_0, window_bounds = array<i64: 8, 4>}, {pipeline_mode = #tpu.pipeline_mode<synchronous>, transform_indices = @transform_1, window_bounds = array<i64: 5, 32, 4>}, {pipeline_mode = #tpu.pipeline_mode<synchronous>, transform_indices = @transform_2, window_bounds = array<i64: 5, 1, 32>}, {pipeline_mode = #tpu.pipeline_mode<synchronous>, transform_indices = @transform_3, window_bounds = array<i64: 5, 16, 32>}, {pipeline_mode = #tpu.pipeline_mode<synchronous>, transform_indices = @transform_4, window_bounds = array<i64: 5, 1, 16>}, {pipeline_mode = #tpu.pipeline_mode<synchronous>, transform_indices = @transform_5, window_bounds = array<i64: 5, 1, 16>}, {pipeline_mode = #tpu.pipeline_mode<synchronous>, transform_indices = @transform_6, window_bounds = array<i64: 5, 1>}, {transform_indices = @transform_7, window_bounds = array<i64: 5, 8>}]} {
    %c0 = arith.constant 0 : index
    %c0_0 = arith.constant 0 : index
    %0 = vector.load %arg1[%c0, %c0_0] : memref<8x4xf32, #tpu.memory_space<vmem>>, vector<8x4xf32>
    %1 = vector.shape_cast %0 : vector<8x4xf32> to vector<1x8x4xf32>
    %2 = vector.broadcast %1 : vector<1x8x4xf32> to vector<5x8x4xf32>
    %c0_1 = arith.constant 0 : index
    %c0_2 = arith.constant 0 : index
    %c0_3 = arith.constant 0 : index
    %3 = vector.load %arg2[%c0_1, %c0_2, %c0_3] : memref<5x32x4xf32, #tpu.memory_space<vmem>>, vector<5x32x4xf32>
    %c0_4 = arith.constant 0 : index
    %c0_5 = arith.constant 0 : index
    %c0_6 = arith.constant 0 : index
    %4 = vector.load %arg3[%c0_4, %c0_5, %c0_6] : memref<5x1x32xf32, #tpu.memory_space<vmem>>, vector<5x1x32xf32>
    "tpu.trace_start"() <{level = 10 : i32, message = "ebk,ehk->ebh"}> : () -> ()
    %cst = arith.constant dense<0.000000e+00> : vector<5x8x32xf32>
    %5 = tpu.matmul %2, %3, %cst {dimension_numbers = #tpu.dot_dimension_numbers<[2], [2], [1], [1], [0, 0, 0, 1, 1, 1], [0], [0]>} : vector<5x8x4xf32>, vector<5x32x4xf32>, vector<5x8x32xf32> -> vector<5x8x32xf32>
    "tpu.trace_stop"() : () -> ()
    %6 = vector.broadcast %4 : vector<5x1x32xf32> to vector<5x8x32xf32>
    %7 = arith.addf %5, %6 : vector<5x8x32xf32>
    %cst_7 = arith.constant 0.000000e+00 : f32
    %8 = vector.broadcast %cst_7 : f32 to vector<5x8x32xf32>
    %9 = arith.maximumf %7, %8 : vector<5x8x32xf32>
    %c0_8 = arith.constant 0 : index
    %c0_9 = arith.constant 0 : index
    %c0_10 = arith.constant 0 : index
    %10 = vector.load %arg4[%c0_8, %c0_9, %c0_10] : memref<5x16x32xf32, #tpu.memory_space<vmem>>, vector<5x16x32xf32>
    %c0_11 = arith.constant 0 : index
    %c0_12 = arith.constant 0 : index
    %c0_13 = arith.constant 0 : index
    %11 = vector.load %arg5[%c0_11, %c0_12, %c0_13] : memref<5x1x16xf32, #tpu.memory_space<vmem>>, vector<5x1x16xf32>
    "tpu.trace_start"() <{level = 10 : i32, message = "ebk,ehk->ebh"}> : () -> ()
    %cst_14 = arith.constant dense<0.000000e+00> : vector<5x8x16xf32>
    %12 = tpu.matmul %9, %10, %cst_14 {dimension_numbers = #tpu.dot_dimension_numbers<[2], [2], [1], [1], [0, 0, 0, 1, 1, 1], [0], [0]>} : vector<5x8x32xf32>, vector<5x16x32xf32>, vector<5x8x16xf32> -> vector<5x8x16xf32>
    "tpu.trace_stop"() : () -> ()
    %13 = vector.broadcast %11 : vector<5x1x16xf32> to vector<5x8x16xf32>
    %14 = arith.addf %12, %13 : vector<5x8x16xf32>
    %cst_15 = arith.constant 0.000000e+00 : f32
    %15 = vector.broadcast %cst_15 : f32 to vector<5x8x16xf32>
    %16 = arith.maximumf %14, %15 : vector<5x8x16xf32>
    %c0_16 = arith.constant 0 : index
    %c0_17 = arith.constant 0 : index
    %c0_18 = arith.constant 0 : index
    %17 = vector.load %arg6[%c0_16, %c0_17, %c0_18] : memref<5x1x16xf32, #tpu.memory_space<vmem>>, vector<5x1x16xf32>
    %c0_19 = arith.constant 0 : index
    %c0_20 = arith.constant 0 : index
    %18 = vector.load %arg7[%c0_19, %c0_20] : memref<5x1xf32, #tpu.memory_space<vmem>>, vector<5x1xf32>
    %19 = vector.broadcast %17 : vector<5x1x16xf32> to vector<5x8x16xf32>
    %20 = arith.mulf %16, %19 : vector<5x8x16xf32>
    %cst_21 = arith.constant dense<0.000000e+00> : vector<5x8xf32>
    %21 = vector.multi_reduction <add>, %20, %cst_21 [2] : vector<5x8x16xf32> to vector<5x8xf32>
    %22 = vector.broadcast %18 : vector<5x1xf32> to vector<5x8xf32>
    %23 = arith.addf %21, %22 : vector<5x8xf32>
    %c0_22 = arith.constant 0 : index
    %c0_23 = arith.constant 0 : index
    %24 = vector.load %arg8[%c0_22, %c0_23] : memref<5x8xf32, #tpu.memory_space<vmem>>, vector<5x8xf32>
    tpu.vector_store %arg8[%c0_22, %c0_23], %23 {strides = array<i32>} : memref<5x8xf32, #tpu.memory_space<vmem>>, vector<5x8xf32>,
    return
  }
  func.func @transform_0(%arg0: i32) -> (i32, i32) {
    %c0_i32 = arith.constant 0 : i32
    %c0_i32_0 = arith.constant 0 : i32
    return %arg0, %c0_i32 : i32, i32
  }
  func.func @transform_1(%arg0: i32) -> (i32, i32, i32) {
    %c0_i32 = arith.constant 0 : i32
    %c0_i32_0 = arith.constant 0 : i32
    %c0_i32_1 = arith.constant 0 : i32
    %c0_i32_2 = arith.constant 0 : i32
    return %c0_i32, %c0_i32_0, %c0_i32_1 : i32, i32, i32
  }
  func.func @transform_2(%arg0: i32) -> (i32, i32, i32) {
    %c0_i32 = arith.constant 0 : i32
    %c0_i32_0 = arith.constant 0 : i32
    %c0_i32_1 = arith.constant 0 : i32
    %c0_i32_2 = arith.constant 0 : i32
    return %c0_i32, %c0_i32_0, %c0_i32_1 : i32, i32, i32
  }
  func.func @transform_3(%arg0: i32) -> (i32, i32, i32) {
    %c0_i32 = arith.constant 0 : i32
    %c0_i32_0 = arith.constant 0 : i32
    %c0_i32_1 = arith.constant 0 : i32
    %c0_i32_2 = arith.constant 0 : i32
    return %c0_i32, %c0_i32_0, %c0_i32_1 : i32, i32, i32
  }
  func.func @transform_4(%arg0: i32) -> (i32, i32, i32) {
    %c0_i32 = arith.constant 0 : i32
    %c0_i32_0 = arith.constant 0 : i32
    %c0_i32_1 = arith.constant 0 : i32
    %c0_i32_2 = arith.constant 0 : i32
    return %c0_i32, %c0_i32_0, %c0_i32_1 : i32, i32, i32
  }
  func.func @transform_5(%arg0: i32) -> (i32, i32, i32) {
    %c0_i32 = arith.constant 0 : i32
    %c0_i32_0 = arith.constant 0 : i32
    %c0_i32_1 = arith.constant 0 : i32
    %c0_i32_2 = arith.constant 0 : i32
    return %c0_i32, %c0_i32_0, %c0_i32_1 : i32, i32, i32
  }
  func.func @transform_6(%arg0: i32) -> (i32, i32) {
    %c0_i32 = arith.constant 0 : i32
    %c0_i32_0 = arith.constant 0 : i32
    %c0_i32_1 = arith.constant 0 : i32
    return %c0_i32, %c0_i32_0 : i32, i32
  }
  func.func @transform_7(%arg0: i32) -> (i32, i32) {
    %c0_i32 = arith.constant 0 : i32
    %c0_i32_0 = arith.constant 0 : i32
    return %c0_i32, %arg0 : i32, i32
  }
}

</mosaic_0001>

<bundles_post_ra>
// kernel: tpu_custom_call.1
= control target key start
LH: loop header
LB: loop body
LE: loop exit
PB: predicated region body
PF: predicated region fallthrough
CT: control target
= control target key end

     0   :  { %vm83_vm0 = vcmask 31744   ;;  %v1382_v3 = vmov 0.0|0.0   ;;  %vm1383_vm2 = vmmov 0   ;;  %v1384_v8 = vmov 0.0   ;;  %s1672_s0 = inlined_call_operand.vmem [shape: f32[8,4], index: 0, kind: input, shape index: {}]   ;;  %s1673_s1 = inlined_call_operand.vmem [shape: f32[5,32,4], index: 1, kind: input, shape index: {}]   ;;  %s1674_s2 = inlined_call_operand.vmem [shape: f32[5,1,32], index: 2, kind: input, shape index: {}]   ;;  %s1675_s3 = inlined_call_operand.vmem [shape: f32[5,16,32], index: 3, kind: input, shape index: {}]   ;;  %s1676_s4 = inlined_call_operand.vmem [shape: f32[5,1,16], index: 4, kind: input, shape index: {}]   ;;  %s1677_s5 = inlined_call_operand.vmem [shape: f32[5,1,16], index: 5, kind: input, shape index: {}]   ;;  %s1678_s6 = inlined_call_operand.vmem [shape: f32[5,1], index: 6, kind: input, shape index: {}]   ;;  %s1679_s7 = inlined_call_operand.hbm [shape: f32[5,8], index: 7, kind: output, shape index: {}]  }
   0x1   :  { %v28_v0 = vld [vmem:[%s1673_s1] sm:$0xff]  ;;  %v29_v1 = vld [vmem:[%s1673_s1 + $0x8] sm:$0xff]  ;;  %1291 = vmatprep.subr.bf16.mxu0 %v1382_v3  ;;  %vm1439_vm1 = vmpackc.low %vm83_vm0, %vm83_vm0  ;;  %1299 = vmatprep.subr.bf16.mxu1 %v1382_v3 }
   0x2   :  { %v32_v2 = vld [vmem:[%s1673_s1 + $0x20] sm:$0xff]  ;;  %v1292_v4 = vpack.c.bf16 %v29_v1, %v28_v0  ;;  %v33_v6 = vld [vmem:[%s1673_s1 + $0x28] sm:$0xff]  ;;  %1209 = vmatprep.mubr.msk.f32.mxu0 %vm1383_vm2, %v1384_v8  ;;  %1220 = vmatprep.mubr.msk.f32.mxu1 %vm1383_vm2, %v1384_v8  ;;  %v30_v9 = vld [vmem:[%s1673_s1 + $0x10] sm:$0xff] }
   0x3   :  { %v1300_v7 = vpack.c.bf16 %v33_v6, %v32_v2  ;;  %v31_v10 = vld [vmem:[%s1673_s1 + $0x18] sm:$0xff]  ;;  %v34_v11 = vld [vmem:[%s1673_s1 + $0x30] sm:$0xff] }
   0x4   :  { %1294 = vmatpush3.bf16.xpose.msk.msra.mxu0 %vm1439_vm1, %v1292_v4  ;;  %v35_v12 = vld [vmem:[%s1673_s1 + $0x38] sm:$0xff]  ;;  %v1296_v13 = vpack.c.bf16 %v31_v10, %v30_v9 }
   0x5   :  { %1302 = vmatpush3.bf16.xpose.msk.msra.mxu1 %vm1439_vm1, %v1300_v7  ;;  %1295 = vmatprep.subr.bf16.mxu0 %v1382_v3  ;;  %v1304_v14 = vpack.c.bf16 %v35_v12, %v34_v11 }
   0x6   :  { %1303 = vmatprep.subr.bf16.mxu1 %v1382_v3 }
   0x7   :  { %12 = vsyncpa [#allocation3], 0  ;;  %v36_v15 = vld [vmem:[%s1673_s1 + $0x40] sm:$0xff]  ;;  %v37_v16 = vld [vmem:[%s1673_s1 + $0x48] sm:$0xff]  ;;  %vm547_vm3 = vcmask 261120   ;;  %v1385_v12 = vmov 0  }
   0x8   :  { %v40_v17 = vld [vmem:[%s1673_s1 + $0x60] sm:$0xff]  ;;  %v41_v18 = vld [vmem:[%s1673_s1 + $0x68] sm:$0xff]  ;;  %v1308_v20 = vpack.c.bf16 %v37_v16, %v36_v15  ;;  %v38_v22 = vld [vmem:[%s1673_s1 + $0x50] sm:$0xff]  ;;  %1356 = vset.pattern.permute.xlu1 %v1385_v12  ;;  %1357 = vset.pattern.permute.xlu0 %v1385_v12  ;;  %vm989_vm5 = vcmask 130048   ;;  %vm1081_vm6 = vcmask 1041409   ;;  %vm1083_vm7 = vcmask 1042434  }
   0x9   :  { %v27_v19 = vld [vmem:[%s1672_s0] sm:$0xff]  ;;  %v1316_v21 = vpack.c.bf16 %v41_v18, %v40_v17  ;;  %v39_v23 = vld [vmem:[%s1673_s1 + $0x58] sm:$0xff]  ;;  %v42_v24 = vld [vmem:[%s1673_s1 + $0x70] sm:$0xff]  ;;  %vm1085_vm8 = vcmask 1043459   ;;  %vm1087_vm9 = vcmask 1044484   ;;  %vm1090_vm10 = vcmask 61440  }
   0xa   :  { %v43_v25 = vld [vmem:[%s1673_s1 + $0x78] sm:$0xff]  ;;  %v1312_v26 = vpack.c.bf16 %v39_v23, %v38_v22  ;;  %v44_v28 = vld [vmem:[%s1673_s1 + $0x80] sm:$0xff]  ;;  %v45_v29 = vld [vmem:[%s1673_s1 + $0x88] sm:$0xff] }
   0xb   :  { %v1320_v27 = vpack.c.bf16 %v43_v25, %v42_v24  ;;  %v502_v30 = vld [vmem:[%s1675_s3] sm:$0xff]  ;;  %v503_v31 = vld [vmem:[%s1675_s3 + $0x8] sm:$0xff]  ;;  %v1324_v32 = vpack.c.bf16 %v45_v29, %v44_v28  ;;  %vm1535_vm4 = vmpackc.low %vm547_vm3, %vm547_vm3 }
   0xc   :  { %1298 = vmatpush3.bf16.xpose.msk.msra.mxu0 %vm1439_vm1, %v1296_v13  ;;  %v1332_v33 = vpack.c.bf16 %v503_v31, %v502_v30  ;;  %v46_v35 = vld [vmem:[%s1673_s1 + $0x90] sm:$0xff]  ;;  %v47_v36 = vld [vmem:[%s1673_s1 + $0x98] sm:$0xff]  ;;  %v506_v38 = vld [vmem:[%s1675_s3 + $0x20] sm:$0xff] }
   0xd   :  { %1306 = vmatpush3.bf16.xpose.msk.msra.mxu1 %vm1439_vm1, %v1304_v14  ;;  %1307 = vmatprep.subr.bf16.mxu0 %v1382_v3  ;;  %v1328_v37 = vpack.c.bf16 %v47_v36, %v46_v35  ;;  %v507_v39 = vld [vmem:[%s1675_s3 + $0x28] sm:$0xff]  ;;  %v1106_v41 = vld [vmem:[%s1674_s2] ss:$0 sm:$0xff]  ;;  %v504_v42 = vld [vmem:[%s1675_s3 + $0x10] sm:$0xff] }
   0xe   :  { %1315 = vmatprep.subr.bf16.mxu1 %v1382_v3  ;;  %v1340_v40 = vpack.c.bf16 %v507_v39, %v506_v38  ;;  %v505_v43 = vld [vmem:[%s1675_s3 + $0x18] sm:$0xff]  ;;  %v1107_v51 = vld [vmem:[%s1674_s2 + $0x1] ss:$0 sm:$0xff]  ;;  %v508_v53 = vld [vmem:[%s1675_s3 + $0x30] sm:$0xff] }
   0xf   :  { %v1336_v49 = vpack.c.bf16 %v505_v43, %v504_v42  ;;  %v509_v54 = vld [vmem:[%s1675_s3 + $0x38] sm:$0xff]  ;;  %v1108_v57 = vld [vmem:[%s1674_s2 + $0x2] ss:$0 sm:$0xff]  ;;  %v1109_v58 = vld [vmem:[%s1674_s2 + $0x3] ss:$0 sm:$0xff] }
  0x10   :  { %v1344_v55 = vpack.c.bf16 %v509_v54, %v508_v53  ;;  %v510_v59 = vld [vmem:[%s1675_s3 + $0x40] sm:$0xff]  ;;  %v511_v60 = vld [vmem:[%s1675_s3 + $0x48] sm:$0xff]  ;;  %v1009_v53 = vlaneseq }
  0x11   :  { %v1110_v6 = vld [vmem:[%s1674_s2 + $0x4] ss:$0 sm:$0xff]  ;;  %v1136_v13 = vld [vmem:[%s1676_s4] ss:$0 sm:$0xff]  ;;  %v1157_v24 = vld [vmem:[%s1677_s5 + $0x1] ss:$0 sm:$0xff] }
  0x12   :  { %v1156_v16 = vld [vmem:[%s1677_s5] ss:$0 sm:$0xff]  ;;  %v1139_v29 = vld [vmem:[%s1676_s4 + $0x3] ss:$0 sm:$0xff]  ;;  %v1158_v36 = vld [vmem:[%s1677_s5 + $0x2] ss:$0 sm:$0xff] }
  0x13   :  { %1210 = vmatmul.mubr.msk.f32.vlgmr.msra.gmra.mrb[0].mxu0 %vm83_vm0, %v27_v19  ;;  %v1159_v38 = vld [vmem:[%s1677_s5 + $0x3] ss:$0 sm:$0xff]  ;;  %v1010_v54 = vshrl.u32 %v1009_v53, 7 }
  0x14   :  { %1310 = vmatpush3.bf16.xpose.msk.msra.mxu0 %vm1439_vm1, %v1308_v20  ;;  %1221 = vmatmul.mubr.msk.f32.vlgmr.msra.gmra.mrb[0].mxu1 %vm83_vm0, %v27_v19 }
  0x15   :  { %1318 = vmatpush3.bf16.xpose.msk.msra.mxu1 %vm1439_vm1, %v1316_v21  ;;  %1311 = vmatprep.subr.bf16.mxu0 %v1382_v3 }
  0x16   :  { %1319 = vmatprep.subr.bf16.mxu1 %v1382_v3  ;;  %1231 = vmatprep.mubr.msk.f32.mxu0 %vm1383_vm2, %v1384_v8 }
  0x17   :  { %1242 = vmatprep.mubr.msk.f32.mxu1 %vm1383_vm2, %v1384_v8 }
  0x1c   :  { %1314 = vmatpush3.bf16.xpose.msk.msra.mxu0 %vm1439_vm1, %v1312_v26 }
  0x1d   :  { %1322 = vmatpush3.bf16.xpose.msk.msra.mxu1 %vm1439_vm1, %v1320_v27  ;;  %1323 = vmatprep.subr.bf16.mxu0 %v1382_v3  ;;  %v1138_v27 = vld [vmem:[%s1676_s4 + $0x2] ss:$0 sm:$0xff] }
  0x1e   :  { %1331 = vmatprep.subr.bf16.mxu1 %v1382_v3 }
  0x23   :  { %1232 = vmatmul.mubr.msk.f32.vlgmr.msra.gmra.mrb[2].mxu0 %vm83_vm0, %v27_v19 }
  0x24   :  { %1326 = vmatpush3.bf16.xpose.msk.msra.mxu0 %vm1439_vm1, %v1324_v32  ;;  %1243 = vmatmul.mubr.msk.f32.vlgmr.msra.gmra.mrb[2].mxu1 %vm83_vm0, %v27_v19 }
  0x25   :  { %1327 = vmatprep.subr.bf16.mxu0 %v1382_v3  ;;  %1253 = vmatprep.mubr.msk.f32.mxu0 %vm1383_vm2, %v1384_v8 }
  0x26   :  { %1334 = vmatpush3.bf16.xpose.msk.msra.mxu1 %vm1535_vm4, %v1332_v33  ;;  %1260 = vmatprep.mubr.msk.f32.mxu1 %vm1383_vm2, %v1384_v8 }
  0x27   :  { %1335 = vmatprep.subr.bf16.mxu1 %v1382_v3 }
  0x2c   :  { %1330 = vmatpush3.bf16.xpose.msk.msra.mxu0 %vm1439_vm1, %v1328_v37 }
  0x2d   :  { %1339 = vmatprep.subr.bf16.mxu0 %v1382_v3 }
  0x33   :  { %1254 = vmatmul.mubr.msk.f32.vlgmr.msra.gmra.mrb[4].mxu0 %vm83_vm0, %v27_v19  ;;  %v1137_v19 = vld [vmem:[%s1676_s4 + $0x1] ss:$0 sm:$0xff] }
  0x34   :  { %1274 = vmatprep.mubr.msk.f32.mxu0 %vm1383_vm2, %v1384_v8  ;;  %1342 = vmatpush3.bf16.xpose.msk.msra.mxu0 %vm1535_vm4, %v1340_v40 }
  0x35   :  { %1347 = vmatprep.subr.bf16.mxu0 %v1382_v3 }
  0xe6   :  { %v165_v44 = vpop.f32.mrb[0].mxu0 }
  0xe7   :  { %v166_v45 = vadd.f32 %v1106_v41, %v165_v44  ;;  %v1211_v46 = vpop.f32.mrb[1].mxu0  ;;  %v247_v47 = vpop.f32.mrb[0].mxu1  ;;  %v1140_v44 = vld [vmem:[%s1676_s4 + $0x4] ss:$0 sm:$0xff]  ;;  %s1386_s4 = smov [#allocation2]  }
  0xe8   :  { %v1222_v48 = vpop.f32.mrb[1].mxu1  ;;  %v248_v52 = vadd.f32 %v1107_v51, %v247_v47 }
  0xe9   :  { %v497_v50 = vmax.f32 %v166_v45, 0.0  ;;  %v1160_v48 = vld [vmem:[%s1677_s5 + $0x4] ss:$0 sm:$0xff]  ;;  %s1098_s5 = sshll.u32 %s1386_s4, 4  ;;  %s1099_s5 = int_to_ptr.vmem [resolvable:$true] %s1098_s5 }
  0xea   :  { %v498_v56 = vmax.f32 %v248_v52, 0.0  ;;  %v953_v52 = vld [vmem:[%s1678_s6] sm:$0x1f]  ;;  %s1358_s6 = scalar_lea.vmem %s1099_s5, 128  ;;  %p1363_p1 = scmp.lt.s32.totalorder %s1099_s5, %s1099_s5 }
  0xeb   :  { %1261 = vmatmul.mubr.msk.f32.vlgmr.msra.gmra.mrb[4].mxu1 %vm547_vm3, %v497_v50  ;;  %p1359_p0 = scmp.ne.s32.totalorder %s1099_s5, %s1358_s6  ;;  %p1364_p2 = scmp.lt.s32.totalorder %s1358_s6, %s1358_s6 }
  0xec   :  { %1338 = vmatpush3.bf16.xpose.msk.msra.mxu1 %vm1535_vm4, %v1336_v49  ;;  %1267 = vmatprep.mubr.msk.f32.mxu1 %vm1383_vm2, %v1384_v8 }
  0xed   :  { %1343 = vmatprep.subr.bf16.mxu1 %v1382_v3  ;;  %v1348_v3 = vpack.c.bf16 %v511_v60, %v510_v59  ;;  %v1015_v59 = vsub.s32 1, %v1010_v54  ;;  %v1011_v60 = vsub.s32 0, %v1010_v54  ;;  %p1365_p3 = por %p1364_p2, %p1363_p1 }
  0xef   :  { %p1366_p4 = pnand %p1365_p3, %p1359_p0 }
  0xf3   :  { %1268 = vmatmul.mubr.msk.f32.vlgmr.msra.gmra.mrb[6].mxu1 %vm547_vm3, %v498_v56 }
  0xf4   :  { %1346 = vmatpush3.bf16.xpose.msk.msra.mxu1 %vm1535_vm4, %v1344_v55  ;;  %1281 = vmatprep.mubr.msk.f32.mxu1 %vm1383_vm2, %v1384_v8  ;;  %v1060_v55 = vand.u32 127, %v1009_v53 }
  0xf6   :  { %v329_v61 = vpop.f32.mrb[2].mxu0  ;;  %v1063_v56 = vsub.s32 %v1060_v55, %v1010_v54 }
  0xf7   :  { %v330_v62 = vadd.f32 %v1108_v57, %v329_v61  ;;  %v1233_v63 = vpop.f32.mrb[3].mxu0  ;;  %v411_v0 = vpop.f32.mrb[2].mxu1 }
  0xf8   :  { %v412_v1 = vadd.f32 %v1109_v58, %v411_v0  ;;  %v1244_v2 = vpop.f32.mrb[3].mxu1 }
  0xf9   :  { %v499_v4 = vmax.f32 %v330_v62, 0.0  ;;  %v1019_v62 = vsub.s32 2, %v1010_v54 }
  0xfa   :  { %v500_v5 = vmax.f32 %v412_v1, 0.0 }
  0xfb   :  { %1275 = vmatmul.mubr.msk.f32.vlgmr.msra.gmra.mrb[6].mxu0 %vm547_vm3, %v499_v4 }
  0xfc   :  { %1282 = vmatmul.mubr.msk.f32.vlgmr.msra.gmra.mrb[8].mxu1 %vm547_vm3, %v500_v5  ;;  %1350 = vmatpush3.bf16.xpose.msk.msra.mxu0 %vm1535_vm4, %v1348_v3 }
  0xfd   :  { %1288 = vmatprep.mubr.msk.f32.mxu0 %vm1383_vm2, %v1384_v8 }
 0x106   :  { %v493_v7 = vpop.f32.mrb[4].mxu0 }
 0x107   :  { %v494_v9 = vadd.f32 %v1110_v6, %v493_v7  ;;  %v1255_v10 = vpop.f32.mrb[5].mxu0  ;;  %v1023_v6 = vsub.s32 3, %v1010_v54 }
 0x108   :  { %v1027_v10 = vsub.s32 4, %v1010_v54 }
 0x109   :  { %v501_v11 = vmax.f32 %v494_v9, 0.0 }
 0x10b   :  { %1289 = vmatmul.mubr.msk.f32.vlgmr.msra.gmra.mrb[8].mxu0 %vm547_vm3, %v501_v11 }
 0x1be   :  { %v623_v14 = vpop.f32.mrb[4].mxu1 }
 0x1bf   :  { %v624_v15 = vadd.f32 %v1136_v13, %v623_v14  ;;  %v1262_v8 = vpop.f32.mrb[5].mxu1 }
 0x1c1   :  { %v943_v17 = vmax.f32 %v624_v15, 0.0 }
 0x1c3   :  { %v984_v18 = vmul.f32 %v1156_v16, %v943_v17 }
 0x1c5   :  { %v990_v20 = vsel %vm989_vm5, %v984_v18, 0.0 }
 0x1c6   :  { %v702_v21 = vpop.f32.mrb[6].mxu1  ;;  %991 = vadd.xlane.f32.xlu0 %v990_v20 }
 0x1c7   :  { %v703_v22 = vadd.f32 %v1137_v19, %v702_v21  ;;  %v1269_v23 = vpop.f32.mrb[7].mxu1 }
 0x1c9   :  { %v944_v25 = vmax.f32 %v703_v22, 0.0 }
 0x1cb   :  { %v985_v26 = vmul.f32 %v1157_v24, %v944_v25 }
 0x1cd   :  { %v993_v28 = vsel %vm989_vm5, %v985_v26, 0.0 }
 0x1ce   :  { %994 = vadd.xlane.f32.xlu0 %v993_v28  ;;  %v781_v30 = vpop.f32.mrb[6].mxu0 }
 0x1cf   :  { %v782_v31 = vadd.f32 %v1138_v27, %v781_v30  ;;  %v1276_v32 = vpop.f32.mrb[7].mxu0  ;;  %v860_v33 = vpop.f32.mrb[8].mxu1 }
 0x1d0   :  { %v861_v34 = vadd.f32 %v1139_v29, %v860_v33  ;;  %v1283_v35 = vpop.f32.mrb[9].mxu1 }
 0x1d1   :  { %v945_v37 = vmax.f32 %v782_v31, 0.0 }
 0x1d2   :  { %v946_v39 = vmax.f32 %v861_v34, 0.0 }
 0x1d3   :  { %v986_v40 = vmul.f32 %v1158_v36, %v945_v37 }
 0x1d4   :  { %v987_v41 = vmul.f32 %v1159_v38, %v946_v39 }
 0x1d5   :  { %v996_v42 = vsel %vm989_vm5, %v986_v40, 0.0 }
 0x1d6   :  { %997 = vadd.xlane.f32.xlu1 %v996_v42  ;;  %v999_v43 = vsel %vm989_vm5, %v987_v41, 0.0 }
 0x1da   :  { %1000 = vadd.xlane.f32.xlu1 %v999_v43 }
 0x1de   :  { %v939_v45 = vpop.f32.mrb[8].mxu0 }
 0x1df   :  { %v940_v46 = vadd.f32 %v1140_v44, %v939_v45  ;;  %v1290_v47 = vpop.f32.mrb[9].mxu0 }
 0x1e1   :  { %v947_v49 = vmax.f32 %v940_v46, 0.0 }
 0x1e3   :  { %v988_v50 = vmul.f32 %v1160_v48, %v947_v49 }
 0x1e5   :  { %v1002_v51 = vsel %vm989_vm5, %v988_v50, 0.0 }
 0x1e6   :  { %1003 = vadd.xlane.f32.xlu0 %v1002_v51 }
 0x1eb   :  { %1007 = vperm.xlu1 %1356, %v953_v52  }
 0x253   :  { %v992_v61 = vpop.xlane.xlu0 %991 }
 0x25b   :  { %v995_v2 = vpop.xlane.xlu0 %994 }
 0x263   :  { %v998_v57 = vpop.xlane.xlu1 %997 }
 0x267   :  { %v1001_v58 = vpop.xlane.xlu1 %1000 }
 0x26b   :  { %v1008_v63 = vpop.permute.xlu1 %1007 }
 0x26c   :  { %v1016_v0 = vrot.slane %v1008_v63, %v1015_v59  ;;  %v1012_v1 = vrot.slane %v1008_v63, %v1011_v60  ;;  %v1020_v5 = vrot.slane %v1008_v63, %v1019_v62  ;;  %v1024_v9 = vrot.slane %v1008_v63, %v1023_v6 }
 0x26d   :  { %v1028_v13 = vrot.slane %v1008_v63, %v1027_v10 }
 0x26e   :  { %v1035_v3 = vadd.f32 %v1016_v0, %v995_v2  ;;  %v1034_v4 = vadd.f32 %v1012_v1, %v992_v61  ;;  %v1036_v7 = vadd.f32 %v1020_v5, %v998_v57  ;;  %v1037_v11 = vadd.f32 %v1024_v9, %v1001_v58 }
 0x270   :  { %1048 = vperm.xlu1 %1356, %v1035_v3   ;;  %1045 = vperm.xlu0 %1357, %v1034_v4  }
 0x273   :  { %v1004_v12 = vpop.xlane.xlu0 %1003 }
 0x274   :  { %1051 = vperm.xlu1 %1356, %v1036_v7   ;;  %v1038_v14 = vadd.f32 %v1028_v13, %v1004_v12 }
 0x278   :  { %1054 = vperm.xlu1 %1356, %v1037_v11  }
 0x27c   :  { %1057 = vperm.xlu1 %1356, %v1038_v14  }
 0x2ef   :  { %v1049_v15 = vpop.permute.xlu1 %1048  ;;  %v1046_v16 = vpop.permute.xlu0 %1045 }
 0x2f0   :  { %v1068_v17 = vrot.slane %v1049_v15, %v1063_v56  ;;  %v1064_v18 = vrot.slane %v1046_v16, %v1063_v56 }
 0x2f2   :  { %v1082_v22 = vsel %vm1081_vm6, %v1068_v17, %v1064_v18 }
 0x2f3   :  { %v1052_v8 = vpop.permute.xlu1 %1051 }
 0x2f4   :  { %v1072_v20 = vrot.slane %v1052_v8, %v1063_v56 }
 0x2f6   :  { %v1084_v24 = vsel %vm1083_vm7, %v1072_v20, %v1082_v22 }
 0x2f7   :  { %v1055_v19 = vpop.permute.xlu1 %1054 }
 0x2f8   :  { %v1076_v21 = vrot.slane %v1055_v19, %v1063_v56 }
 0x2fa   :  { %v1086_v26 = vsel %vm1085_vm8, %v1076_v21, %v1084_v24 }
 0x2fb   :  { %v1058_v23 = vpop.permute.xlu1 %1057 }
 0x2fc   :  { %v1080_v25 = vrot.slane %v1058_v23, %v1063_v56 }
 0x2fe   :  { %v1088_v27 = vsel %vm1087_vm9, %v1080_v25, %v1086_v26 }
 0x2ff   :  { %1091 = vst.msk [vmem:[#allocation2] sm:$0x1f] %vm1090_vm10, %v1088_v27 }
 0x300   :  { %1369 = shalt.err (!%p1366_p4)
}
 0x301   :  { %s1370_s21 = scalar_lea.hbm %s1679_s7, 128 }
 0x302   :  { %p1371_p5 = scmp.ne.s32.totalorder %s1679_s7, %s1370_s21  ;;  %p1374_p6 = scmp.lt.u32.totalorder %s1370_s21, %s1679_s7 }
 0x304   :  { %p1376_p7 = pnand %p1374_p6, %p1371_p5 }
 0x306   :  { %1379 = shalt.err (!%p1376_p7)
}
 0x307   :  { %1101 = dma.vmem_to_hbm [thread:$0]  %s1099_s5, 128, %s1679_s7, [#allocation3]  }
 0x308   :  { %1380 = dma.done.wait [#allocation3], 128  }
 0x309   :  { %1381 = vsyncadd [#allocation3], 4294967168 }
 0x30a   :  { %1105 = vsyncpa [#allocation3], 1 }

</bundles_post_ra>
